<compile_context>
chip_gen: v7x
topology: tpu7x:2x2x1
jax: 0.10.0
libtpu: 0.0.40
codegen_flags: <defaults>
</compile_context>

<pallas_src>
import functools

import jax
import jax.numpy as jnp
from jax.experimental import pallas as pl
from jax.experimental.pallas import tpu as pltpu


# ---------------------------------------------------------------------------
# Kernels
# ---------------------------------------------------------------------------
def _gates(pre, s):
    """pre: (tb, 4S) f32 with gate order [forget, in_sigmoid, output | in_tanh]."""
    sig = jax.nn.sigmoid(pre[:, : 3 * s])      # one contiguous EUP slab
    in_tanh = jnp.tanh(pre[:, 3 * s:])         # one contiguous EUP slab
    forget_g = sig[:, :s]
    input_s = sig[:, s:2 * s]
    output_g = sig[:, 2 * s:3 * s]
    return forget_g, input_s, output_g, in_tanh


def _lstm1_step_kernel(x_ref, h_ref, c_ref, wx_ref, wh_ref, b_ref, co_ref):
    # x_ref: (tb, in)   h_ref: (tb, out)   c_ref: (tb, S)
    # wx_ref: (in, 4S)  wh_ref: (out, 4S)  b_ref: (1, 4S)  co_ref: (tb, 2S)
    mm_dtype = wx_ref.dtype
    x = x_ref[...].astype(mm_dtype)            # in-vreg cast (free under MXU/DMA)
    h = h_ref[...].astype(mm_dtype)
    pre = (jnp.dot(x, wx_ref[...], preferred_element_type=jnp.float32)
           + jnp.dot(h, wh_ref[...], preferred_element_type=jnp.float32)
           + b_ref[...])

    s = c_ref.shape[1]
    forget_g, input_s, output_g, in_tanh = _gates(pre, s)

    c_new = forget_g * c_ref[...] + input_s * in_tanh   # current_state
    out = jnp.tanh(c_new) * output_g                    # output

    # Single lane-contiguous store: [c_new | out]
    co_ref[...] = jnp.concatenate([c_new, out], axis=-1).astype(co_ref.dtype)


def _lstm1_seq_kernel(x_ref, h0_ref, c0_ref, wx_ref, wh_ref, b_ref,
                      co_ref, h_scr, c_scr):
    # Grid: (batch_tiles [parallel], T [arbitrary]); weights VMEM-resident,
    # h/c carried in VMEM scratch across the time axis.
    t = pl.program_id(1)

    @pl.when(t == 0)
    def _():
        h_scr[...] = h0_ref[...].astype(jnp.float32)
        c_scr[...] = c0_ref[...].astype(jnp.float32)

    mm_dtype = wx_ref.dtype
    x = x_ref[0].astype(mm_dtype)               # (tb, in)
    h = h_scr[...].astype(mm_dtype)             # (tb, out)
    pre = (jnp.dot(x, wx_ref[...], preferred_element_type=jnp.float32)
           + jnp.dot(h, wh_ref[...], preferred_element_type=jnp.float32)
           + b_ref[...])

    s = c_scr.shape[1]
    forget_g, input_s, output_g, in_tanh = _gates(pre, s)

    c_new = forget_g * c_scr[...] + input_s * in_tanh
    out = jnp.tanh(c_new) * output_g

    c_scr[...] = c_new                          # carry state in VMEM
    h_scr[...] = out
    co_ref[0] = jnp.concatenate([c_new, out], axis=-1).astype(co_ref.dtype)


# ---------------------------------------------------------------------------
# Wrappers
# ---------------------------------------------------------------------------
def _round_up(x, m):
    return -(-x // m) * m


def _choose_batch_tiling(B, batch_tile):
    Bp = _round_up(max(B, 1), 8)
    tb = min(batch_tile, Bp)
    # v7x: if everything fits in one tile, split it so both TCs get work.
    if Bp <= batch_tile and Bp >= 16:
        tb = _round_up(Bp // 2, 8)
    Bp = _round_up(Bp, tb)
    return Bp, tb


@functools.partial(jax.jit, static_argnames=("batch_tile",))
def lstm1_forward(inp, prev_output, prev_cell_state, fused_params,
                  batch_tile=512):
    """One LSTM1 step.

    inp: (B, in), prev_output: (B, out), prev_cell_state: (B, S).
    fused_params = (wx, wh, b): wx (in, 4S), wh (out, 4S), b (1, 4S) f32,
    gate order [forget, in_sigmoid, output, in_tanh].
    Returns (current_state, output), both (B, S) float32.
    """
    wx, wh, b = fused_params
    B, in_size = inp.shape
    out_size = prev_output.shape[1]
    S = prev_cell_state.shape[1]

    Bp, tb = _choose_batch_tiling(B, batch_tile)
    pad = Bp - B
    if pad:
        inp = jnp.pad(inp, ((0, pad), (0, 0)))
        prev_output = jnp.pad(prev_output, ((0, pad), (0, 0)))
        prev_cell_state = jnp.pad(prev_cell_state, ((0, pad), (0, 0)))

    grid = (Bp // tb,)
    in_specs = [
        pl.BlockSpec((tb, in_size), lambda i: (i, 0)),
        pl.BlockSpec((tb, out_size), lambda i: (i, 0)),
        pl.BlockSpec((tb, S), lambda i: (i, 0)),
        pl.BlockSpec((in_size, 4 * S), lambda i: (0, 0)),   # resident weights
        pl.BlockSpec((out_size, 4 * S), lambda i: (0, 0)),
        pl.BlockSpec((1, 4 * S), lambda i: (0, 0)),
    ]
    out_specs = pl.BlockSpec((tb, 2 * S), lambda i: (i, 0))

    co = pl.pallas_call(
        _lstm1_step_kernel,
        out_shape=jax.ShapeDtypeStruct((Bp, 2 * S), jnp.float32),
        grid=grid,
        in_specs=in_specs,
        out_specs=out_specs,
        compiler_params=pltpu.CompilerParams(
            dimension_semantics=("parallel",)),
    )(inp, prev_output, prev_cell_state.astype(jnp.float32), wx, wh,
      b.astype(jnp.float32))

    return co[:B, :S], co[:B, S:]


@functools.partial(jax.jit, static_argnames=("batch_tile",))
def lstm1_sequence_forward(x_seq, h0, c0, fused_params, batch_tile=512):
    """Run the LSTM1 recurrence over a whole sequence inside one kernel.

    x_seq: (T, B, in), h0: (B, out), c0: (B, S); requires out == S (the module
    feeds `output` back as `prev_output`). Returns (c_seq, out_seq): (T, B, S).
    """
    wx, wh, b = fused_params
    T, B, in_size = x_seq.shape
    out_size = h0.shape[1]
    S = c0.shape[1]
    assert out_size == S, "recurrence requires out_size == state_size"

    Bp, tb = _choose_batch_tiling(B, batch_tile)
    pad = Bp - B
    if pad:
        x_seq = jnp.pad(x_seq, ((0, 0), (0, pad), (0, 0)))
        h0 = jnp.pad(h0, ((0, pad), (0, 0)))
        c0 = jnp.pad(c0, ((0, pad), (0, 0)))

    grid = (Bp // tb, T)  # time is the inner (fast) axis
    in_specs = [
        pl.BlockSpec((1, tb, in_size), lambda i, t: (t, i, 0)),
        pl.BlockSpec((tb, out_size), lambda i, t: (i, 0)),
        pl.BlockSpec((tb, S), lambda i, t: (i, 0)),
        pl.BlockSpec((in_size, 4 * S), lambda i, t: (0, 0)),   # resident weights
        pl.BlockSpec((out_size, 4 * S), lambda i, t: (0, 0)),
        pl.BlockSpec((1, 4 * S), lambda i, t: (0, 0)),
    ]
    out_specs = pl.BlockSpec((1, tb, 2 * S), lambda i, t: (t, i, 0))

    co_seq = pl.pallas_call(
        _lstm1_seq_kernel,
        out_shape=jax.ShapeDtypeStruct((T, Bp, 2 * S), jnp.float32),
        grid=grid,
        in_specs=in_specs,
        out_specs=out_specs,
        scratch_shapes=[pltpu.VMEM((tb, out_size), jnp.float32),
                        pltpu.VMEM((tb, S), jnp.float32)],
        compiler_params=pltpu.CompilerParams(
            dimension_semantics=("parallel", "arbitrary")),
    )(x_seq, h0, c0.astype(jnp.float32), wx, wh, b.astype(jnp.float32))

    return co_seq[:, :B, :S], co_seq[:, :B, S:]


# ---------------------------------------------------------------------------
# Parameter construction (torch.nn.Linear layout) + fusion for the kernels.
# ---------------------------------------------------------------------------
def init_torch_like_params(key, in_size, out_size, state_size):
    """Four affine maps in torch.nn.Linear layout: W (S, D), b (1, S); D = in+out."""
    D = in_size + out_size
    keys = jax.random.split(key, 8)
    bound = 1.0 / jnp.sqrt(D)

    def w(k):
        return jax.random.uniform(k, (state_size, D), jnp.float32, -bound, bound)

    def bvec(k):
        return jax.random.uniform(k, (1, state_size), jnp.float32, -bound, bound)

    return (w(keys[0]), bvec(keys[1]),   # forget gate
            w(keys[2]), bvec(keys[3]),   # input gate - sigmoid branch
            w(keys[4]), bvec(keys[5]),   # input gate - tanh branch
            w(keys[6]), bvec(keys[7]))   # output gate


def fuse_params(torch_params, in_size, matmul_dtype=jnp.bfloat16):
    """Fuse the 4 gate linears into pre-transposed (in,4S)/(out,4S) weights + (1,4S) bias.

    Gate order is [forget, input_sigmoid, output, input_tanh] -- this is an
    explicit contract with the kernels' contiguous sigmoid/tanh slabs.
    """
    wf, bf, wif, bif, wit, bit, wo, bo = torch_params
    ws = (wf, wif, wo, wit)   # sigmoid gates first, tanh branch last
    bs = (bf, bif, bo, bit)
    wx = jnp.concatenate([w[:, :in_size] for w in ws], axis=0).T   # (in, 4S)
    wh = jnp.concatenate([w[:, in_size:] for w in ws], axis=0).T   # (out, 4S)
    b = jnp.concatenate(bs, axis=1)                                # (1, 4S)
    return wx.astype(matmul_dtype), wh.astype(matmul_dtype), b.astype(jnp.float32)


def reference_forward(inp, prev_output, prev_cell_state, torch_params):
    """Pure-JAX reference mirroring the PyTorch module semantics."""
    wf, bf, wif, bif, wit, bit, wo, bo = torch_params
    x = jnp.concatenate([inp, prev_output], axis=1)
    lin = lambda w, b: x @ w.T + b
    f = jax.nn.sigmoid(lin(wf, bf))
    ig = jax.nn.sigmoid(lin(wif, bif)) * jnp.tanh(lin(wit, bit))
    og = jax.nn.sigmoid(lin(wo, bo))
    c = f * prev_cell_state + ig
    o = jnp.tanh(c) * og
    return c, o


if __name__ == "__main__":
    batch = 2
    in_size = 16
    out_size = 32
    state_size = 32
    seq_len = 8
    # forget_gate_hidden_size / input_gate_hidden_size are dead at forward time.

    key = jax.random.PRNGKey(0)
    k_x, k_h, k_c, k_p, k_s = jax.random.split(key, 5)

    x = jax.random.normal(k_x, (batch, in_size), jnp.float32)
    prev_out = jax.random.normal(k_h, (batch, out_size), jnp.float32)
    prev_cell = jax.random.normal(k_c, (batch, state_size), jnp.float32)
    x_seq = jax.random.normal(k_s, (seq_len, batch, in_size), jnp.float32)

    torch_params = init_torch_like_params(k_p, in_size, out_size, state_size)
    fused_f32 = fuse_params(torch_params, in_size, matmul_dtype=jnp.float32)
    fused_bf16 = fuse_params(torch_params, in_size, matmul_dtype=jnp.bfloat16)

    # --- single step, f32 matmul path (exact check) ---
    c_new, out = lstm1_forward(x, prev_out, prev_cell, fused_f32)
    jax.block_until_ready((c_new, out))
    c_ref, o_ref = reference_forward(x, prev_out, prev_cell, torch_params)
    assert c_new.shape == c_ref.shape and out.shape == o_ref.shape
    assert jnp.allclose(c_new, c_ref, atol=1e-5), "cell state mismatch (f32 step)"
    assert jnp.allclose(out, o_ref, atol=1e-5), "output mismatch (f32 step)"

    # --- single step, bf16 MXU operands (default fast path on all gens) ---
    c_bf, o_bf = lstm1_forward(x, prev_out, prev_cell, fused_bf16)
    jax.block_until_ready((c_bf, o_bf))
    assert jnp.allclose(c_bf, c_ref, atol=5e-2), "cell state mismatch (bf16 step)"
    assert jnp.allclose(o_bf, o_ref, atol=5e-2), "output mismatch (bf16 step)"

    # --- full sequence inside one kernel (weights + h/c VMEM-resident) ---
    c_seq, o_seq = lstm1_sequence_forward(x_seq, prev_out, prev_cell, fused_f32)
    jax.block_until_ready((c_seq, o_seq))
    c_r, o_r = prev_cell, prev_out
    for t in range(seq_len):
        c_r, o_r = reference_forward(x_seq[t], o_r, c_r, torch_params)
        assert jnp.allclose(c_seq[t], c_r, atol=1e-4), f"seq cell mismatch t={t}"
        assert jnp.allclose(o_seq[t], o_r, atol=1e-4), f"seq output mismatch t={t}"

    # bf16 sequence path: compile/run check (error accumulates over T steps,
    # so only verify it produces finite, correctly-shaped results here).
    c_sb, o_sb = lstm1_sequence_forward(x_seq, prev_out, prev_cell, fused_bf16)
    jax.block_until_ready((c_sb, o_sb))
    assert c_sb.shape == (seq_len, batch, state_size)
    assert bool(jnp.all(jnp.isfinite(c_sb))) and bool(jnp.all(jnp.isfinite(o_sb)))

    print("KERNEL_OK")
</pallas_src>

<mosaic_0001>
module attributes {stable_mosaic.version = 11 : i64} {
  func.func @_lstm1_step_kernel(%arg0: i32, %arg1: memref<8x16xf32, #tpu.memory_space<vmem>>, %arg2: memref<8x32xf32, #tpu.memory_space<vmem>>, %arg3: memref<8x32xf32, #tpu.memory_space<vmem>>, %arg4: memref<16x128xf32, #tpu.memory_space<vmem>>, %arg5: memref<32x128xf32, #tpu.memory_space<vmem>>, %arg6: memref<1x128xf32, #tpu.memory_space<vmem>>, %arg7: memref<8x64xf32, #tpu.memory_space<vmem>>) attributes {dimension_semantics = [#tpu.dimension_semantics<parallel>], iteration_bounds = array<i64: 1>, scalar_prefetch = 0 : i64, scratch_operands = 0 : i64, tpu.core_type = #tpu.core_type<tc>, window_params = [{transform_indices = @transform_0, window_bounds = array<i64: 8, 16>}, {transform_indices = @transform_1, window_bounds = array<i64: 8, 32>}, {transform_indices = @transform_2, window_bounds = array<i64: 8, 32>}, {pipeline_mode = #tpu.pipeline_mode<synchronous>, transform_indices = @transform_3, window_bounds = array<i64: 16, 128>}, {pipeline_mode = #tpu.pipeline_mode<synchronous>, transform_indices = @transform_4, window_bounds = array<i64: 32, 128>}, {pipeline_mode = #tpu.pipeline_mode<synchronous>, transform_indices = @transform_5, window_bounds = array<i64: 1, 128>}, {transform_indices = @transform_6, window_bounds = array<i64: 8, 64>}]} {
    %c0 = arith.constant 0 : index
    %c0_0 = arith.constant 0 : index
    %0 = vector.load %arg1[%c0, %c0_0] : memref<8x16xf32, #tpu.memory_space<vmem>>, vector<8x16xf32>
    %c0_1 = arith.constant 0 : index
    %c0_2 = arith.constant 0 : index
    %1 = vector.load %arg2[%c0_1, %c0_2] : memref<8x32xf32, #tpu.memory_space<vmem>>, vector<8x32xf32>
    %c0_3 = arith.constant 0 : index
    %c0_4 = arith.constant 0 : index
    %2 = vector.load %arg4[%c0_3, %c0_4] : memref<16x128xf32, #tpu.memory_space<vmem>>, vector<16x128xf32>
    %cst = arith.constant dense<0.000000e+00> : vector<8x128xf32>
    %3 = tpu.matmul %0, %2, %cst {dimension_numbers = #tpu.dot_dimension_numbers<[1], [0], [0], [1], [0, 0, 1, 1], [], []>} : vector<8x16xf32>, vector<16x128xf32>, vector<8x128xf32> -> vector<8x128xf32>
    %c0_5 = arith.constant 0 : index
    %c0_6 = arith.constant 0 : index
    %4 = vector.load %arg5[%c0_5, %c0_6] : memref<32x128xf32, #tpu.memory_space<vmem>>, vector<32x128xf32>
    %cst_7 = arith.constant dense<0.000000e+00> : vector<8x128xf32>
    %5 = tpu.matmul %1, %4, %cst_7 {dimension_numbers = #tpu.dot_dimension_numbers<[1], [0], [0], [1], [0, 0, 1, 1], [], []>} : vector<8x32xf32>, vector<32x128xf32>, vector<8x128xf32> -> vector<8x128xf32>
    %6 = arith.addf %3, %5 : vector<8x128xf32>
    %c0_8 = arith.constant 0 : index
    %c0_9 = arith.constant 0 : index
    %7 = vector.load %arg6[%c0_8, %c0_9] : memref<1x128xf32, #tpu.memory_space<vmem>>, vector<1x128xf32>
    %8 = vector.broadcast %7 : vector<1x128xf32> to vector<8x128xf32>
    %9 = arith.addf %6, %8 : vector<8x128xf32>
    %10 = vector.extract_strided_slice %9 {offsets = [0, 0], sizes = [8, 96], strides = [1, 1]} : vector<8x128xf32> to vector<8x96xf32>
    %11 = arith.negf %10 : vector<8x96xf32>
    %12 = math.exp %11 : vector<8x96xf32>
    %cst_10 = arith.constant 1.000000e+00 : f32
    %13 = vector.broadcast %cst_10 : f32 to vector<8x96xf32>
    %14 = arith.addf %13, %12 : vector<8x96xf32>
    %15 = arith.divf %13, %14 : vector<8x96xf32>
    %16 = vector.extract_strided_slice %9 {offsets = [0, 96], sizes = [8, 32], strides = [1, 1]} : vector<8x128xf32> to vector<8x32xf32>
    %17 = math.tanh %16 : vector<8x32xf32>
    %18 = vector.extract_strided_slice %15 {offsets = [0, 0], sizes = [8, 32], strides = [1, 1]} : vector<8x96xf32> to vector<8x32xf32>
    %19 = vector.extract_strided_slice %15 {offsets = [0, 32], sizes = [8, 32], strides = [1, 1]} : vector<8x96xf32> to vector<8x32xf32>
    %20 = vector.extract_strided_slice %15 {offsets = [0, 64], sizes = [8, 32], strides = [1, 1]} : vector<8x96xf32> to vector<8x32xf32>
    %c0_11 = arith.constant 0 : index
    %c0_12 = arith.constant 0 : index
    %21 = vector.load %arg3[%c0_11, %c0_12] : memref<8x32xf32, #tpu.memory_space<vmem>>, vector<8x32xf32>
    %22 = arith.mulf %18, %21 : vector<8x32xf32>
    %23 = arith.mulf %19, %17 : vector<8x32xf32>
    %24 = arith.addf %22, %23 : vector<8x32xf32>
    %25 = math.tanh %24 : vector<8x32xf32>
    %26 = arith.mulf %25, %20 : vector<8x32xf32>
    %27 = tpu.concatenate %24, %26 in 1 : vector<8x32xf32>, vector<8x32xf32> -> vector<8x64xf32>
    %c0_13 = arith.constant 0 : index
    %c0_14 = arith.constant 0 : index
    %28 = vector.load %arg7[%c0_13, %c0_14] : memref<8x64xf32, #tpu.memory_space<vmem>>, vector<8x64xf32>
    tpu.vector_store %arg7[%c0_13, %c0_14], %27 {strides = array<i32>} : memref<8x64xf32, #tpu.memory_space<vmem>>, vector<8x64xf32>,
    return
  }
  func.func @transform_0(%arg0: i32) -> (i32, i32) {
    %c0_i32 = arith.constant 0 : i32
    %c0_i32_0 = arith.constant 0 : i32
    return %arg0, %c0_i32 : i32, i32
  }
  func.func @transform_1(%arg0: i32) -> (i32, i32) {
    %c0_i32 = arith.constant 0 : i32
    %c0_i32_0 = arith.constant 0 : i32
    return %arg0, %c0_i32 : i32, i32
  }
  func.func @transform_2(%arg0: i32) -> (i32, i32) {
    %c0_i32 = arith.constant 0 : i32
    %c0_i32_0 = arith.constant 0 : i32
    return %arg0, %c0_i32 : i32, i32
  }
  func.func @transform_3(%arg0: i32) -> (i32, i32) {
    %c0_i32 = arith.constant 0 : i32
    %c0_i32_0 = arith.constant 0 : i32
    %c0_i32_1 = arith.constant 0 : i32
    return %c0_i32, %c0_i32_0 : i32, i32
  }
  func.func @transform_4(%arg0: i32) -> (i32, i32) {
    %c0_i32 = arith.constant 0 : i32
    %c0_i32_0 = arith.constant 0 : i32
    %c0_i32_1 = arith.constant 0 : i32
    return %c0_i32, %c0_i32_0 : i32, i32
  }
  func.func @transform_5(%arg0: i32) -> (i32, i32) {
    %c0_i32 = arith.constant 0 : i32
    %c0_i32_0 = arith.constant 0 : i32
    %c0_i32_1 = arith.constant 0 : i32
    return %c0_i32, %c0_i32_0 : i32, i32
  }
  func.func @transform_6(%arg0: i32) -> (i32, i32) {
    %c0_i32 = arith.constant 0 : i32
    %c0_i32_0 = arith.constant 0 : i32
    return %arg0, %c0_i32 : i32, i32
  }
}

</mosaic_0001>

<bundles_post_ra>
// kernel: lstm1_forward.1
= control target key start
LH: loop header
LB: loop body
LE: loop exit
PB: predicated region body
PF: predicated region fallthrough
CT: control target
= control target key end

     0   :  { %v276_v0 = vmov 0.0|0.0   ;;  %vm277_vm0 = vmmov 0   ;;  %v278_v8 = vmov 0.0   ;;  %vm105_vm1 = vcmask 130048   ;;  %s281_s14 = smov 32   ;;  %s352_s4 = inlined_call_operand.vmem [shape: f32[32,128], index: 4, kind: input, shape index: {}]   ;;  %s353_s3 = inlined_call_operand.vmem [shape: f32[16,128], index: 3, kind: input, shape index: {}]   ;;  %s354_s0 = inlined_call_operand.vmem [shape: f32[8,16], index: 0, kind: input, shape index: {}]   ;;  %s355_s1 = inlined_call_operand.vmem [shape: f32[8,32], index: 1, kind: input, shape index: {}]   ;;  %s356_s5 = inlined_call_operand.vmem [shape: f32[1,128], index: 5, kind: input, shape index: {}]   ;;  %s357_s2 = inlined_call_operand.vmem [shape: f32[8,32], index: 2, kind: input, shape index: {}]   ;;  %s358_s6 = inlined_call_operand.vmem [shape: f32[8,64], index: 6, kind: output, shape index: {}]  }
   0x1   :  { %253 = vmatprep.subr.bf16.mxu0 %v276_v0  ;;  %v27_v1 = vld [vmem:[%s352_s4] sm:$0xff]  ;;  %v28_v2 = vld [vmem:[%s352_s4 + $0x8] sm:$0xff]  ;;  %259 = vmatprep.subr.bf16.mxu1 %v276_v0  ;;  %v29_v6 = vld [vmem:[%s352_s4 + $0x10] sm:$0xff]  ;;  %vm31_vm2 = vcmask 261120   ;;  %vm217_vm3 = vcmask 523264  }
   0x2   :  { %v25_v3 = vld [vmem:[%s353_s3] sm:$0xff]  ;;  %v254_v4 = vpack.c.bf16 %v28_v2, %v27_v1  ;;  %v26_v5 = vld [vmem:[%s353_s3 + $0x8] sm:$0xff]  ;;  %v30_v7 = vld [vmem:[%s352_s4 + $0x18] sm:$0xff]  ;;  %250 = vmatprep.mubr.msk.f32.mxu1 %vm277_vm0, %v278_v8  ;;  %243 = vmatprep.mubr.msk.f32.mxu0 %vm277_vm0, %v278_v8 }
   0x3   :  { %v260_v9 = vpack.c.bf16 %v26_v5, %v25_v3  ;;  %v257_v10 = vpack.c.bf16 %v30_v7, %v29_v6  ;;  %v23_v11 = vld [vmem:[%s354_s0] sm:$0xff]  ;;  %s279_s0 = smov 64  }
   0x4   :  { %255 = vmatpush3.bf16.msra.mxu0 %v254_v4  ;;  %v24_v12 = vld [vmem:[%s355_s1] sm:$0xff]  ;;  %s280_s1 = smov 96  }
   0x5   :  { %256 = vmatprep.subr.bf16.mxu0 %v276_v0  ;;  %261 = vmatpush3.bf16.msra.mxu1 %v260_v9  ;;  %v225_v16 = vld [vmem:[%s356_s5] ss:$0 sm:$0xff] }
   0x6   :  { %v194_v27 = vld [vmem:[%s357_s2] sm:$0xff] }
   0x8   :  { %258 = vmatpush3.bf16.msra.mxu0 %v257_v10  ;;  %251 = vmatmul.mubr.msk.f32.vlgmr.msra.gmra.mrb[0].mxu1 %vm105_vm1, %v23_v11 }
   0xb   :  { %244 = vmatmul.mubr.msk.f32.vlgmr.msra.gmra.mrb[0].mxu0 %vm31_vm2, %v24_v12 }
  0xdb   :  { %v175_v13 = vpop.f32.mrb[0].mxu1 }
  0xdc   :  { %v252_v14 = vpop.f32.mrb[1].mxu1 }
  0xde   :  { %v101_v15 = vpop.f32.mrb[0].mxu0 }
  0xdf   :  { %v176_v17 = vadd.f32 %v175_v13, %v101_v15  ;;  %v245_v18 = vpop.f32.mrb[1].mxu0 }
  0xe1   :  { %v186_v19 = vadd.f32 %v225_v16, %v176_v17 }
  0xe3   :  { %v226_v20 = vmul.f32 -1.442695, %v186_v19  ;;  %268 = vtanh.f32 %v186_v19 }
  0xe5   :  { %270 = vpow2.f32 %v226_v20 }
  0xed   :  { %v269_v21 = vpop.eup %268 }
  0xee   :  { %197 = vrot.lane.b32.xlu0 %v269_v21, %s279_s0 }
  0xef   :  { %v271_v22 = vpop.eup %270 }
  0xf0   :  { %v190_v23 = vadd.f32 1.0, %v271_v22 }
  0xf2   :  { %272 = vrcp.f32 %v190_v23 }
  0xfc   :  { %v273_v24 = vpop.eup %272 }
  0xfd   :  { %208 = vrot.lane.b32.xlu1 %v273_v24, %s279_s0  ;;  %v195_v28 = vmul.f32 %v273_v24, %v194_v27 }
 0x160   :  { %v198_v25 = vpop.permute.xlu0 %197 }
 0x161   :  { %v200_v26 = vmul.f32 %v273_v24, %v198_v25 }
 0x163   :  { %202 = vrot.lane.b32.xlu0 %v200_v26, %s280_s1 }
 0x16f   :  { %v209_v32 = vpop.permute.xlu1 %208 }
 0x1d5   :  { %v203_v29 = vpop.permute.xlu0 %202 }
 0x1d6   :  { %v205_v30 = vadd.f32 %v203_v29, %v195_v28 }
 0x1d8   :  { %274 = vtanh.f32 %v205_v30 }
 0x1e2   :  { %v275_v31 = vpop.eup %274 }
 0x1e3   :  { %v211_v33 = vmul.f32 %v275_v31, %v209_v32 }
 0x1e5   :  { %213 = vrot.lane.b32.xlu1 %v211_v33, %s281_s14 }
 0x257   :  { %v214_v34 = vpop.permute.xlu1 %213 }
 0x258   :  { %v216_v35 = vsel %vm31_vm2, %v205_v30, %v214_v34 }
 0x259   :  { %218 = vst.msk [vmem:[%s358_s6] sm:$0xff] %vm217_vm3, %v216_v35 }

</bundles_post_ra>
